<compile_context>
chip_gen: v5e
topology: v5e:2x2
jax: 0.10.0
libtpu: 0.0.40
codegen_flags: <defaults>
</compile_context>

<pallas_src>
import jax
import jax.numpy as jnp
from jax.experimental import pallas as pl
from jax.experimental.pallas import tpu as pltpu


# ---------------------------------------------------------------------------
# helpers
# ---------------------------------------------------------------------------
def _round_up(x: int, m: int) -> int:
    return ((x + m - 1) // m) * m


def _pick_tile(dim: int, preferred: int, align: int) -> int:
    """Largest tile <= preferred that is a multiple of `align` and divides
    `dim`.  `dim` must already be a multiple of `align` (callers pad first),
    so the result is always aligned AND bounded (no full-dim fallback)."""
    assert dim % align == 0, (dim, align)
    if dim <= preferred:
        return dim
    t = (preferred // align) * align
    while t > align:
        if dim % t == 0:
            return t
        t -= align
    return align


# ---------------------------------------------------------------------------
# Kernels: out = x @ W + b   (bf16 operands, f32 accumulate, f32 output)
# ---------------------------------------------------------------------------
def _affine_kernel_2d(x_ref, w_ref, b_ref, o_ref):
    # Whole K dim in one tile: single MXU dot + bias, no accumulator lifecycle.
    o_ref[...] = (jnp.dot(x_ref[...], w_ref[...],
                          preferred_element_type=jnp.float32)
                  + b_ref[...]).astype(o_ref.dtype)


def _affine_kernel_3d(x_ref, w_ref, b_ref, o_ref):
    # K-reduction grid axis (last).  The output tile's index_map ignores k, so
    # it stays VMEM-resident across the whole reduction: accumulate directly
    # into o_ref (no f32 scratch, no finalize copy/cast).
    k = pl.program_id(2)

    @pl.when(k == 0)
    def _():
        o_ref[...] = jnp.zeros_like(o_ref)

    o_ref[...] += jnp.dot(x_ref[...], w_ref[...],
                          preferred_element_type=jnp.float32)

    @pl.when(k == pl.num_programs(2) - 1)
    def _():
        o_ref[...] += b_ref[...]        # bias only once, on the final step


# ---------------------------------------------------------------------------
# Wrapper
# ---------------------------------------------------------------------------
def taylor_cross_attention_forward(input_, other, params, cfg):
    """`params` = (w_comb_padded, b_comb_padded) from init_params.  Mirrors the
    PyTorch module's shape asserts; `input_` only participates in the asserts."""
    w_p, b_p = params

    B, S_in, F_in = input_.shape
    assert other.shape[0] == B
    assert F_in == cfg["input_features"]
    assert S_in == cfg["sequence_length"]
    _, S_other, F_other = other.shape
    assert S_other == cfg["sequence_length_other"]
    assert F_other == cfg["other_features"]

    S = cfg["sequence_length"]
    F_out = cfg["output_features"]
    M, K, N = B, S_other * F_other, S * F_out

    compute_dtype = w_p.dtype
    Mp = _round_up(M, 8)
    Kp = _round_up(K, 128)
    Np = _round_up(N, 128)
    assert w_p.shape == (Kp, Np) and b_p.shape == (1, Np)

    # Zero-pad the activation to the aligned slab (padded K columns hit the
    # zero-padded W rows -> exact result, no masking needed).
    x = other.reshape(M, K).astype(compute_dtype)
    x_p = jnp.zeros((Mp, Kp), compute_dtype).at[:M, :K].set(x)

    # ---- tile selection -----------------------------------------------------
    tm = _pick_tile(Mp, 512, 8)

    # Large tn for the HBM roofline, but keep >=2 j-blocks when N allows so the
    # "parallel" j axis can shard across v7x's two TensorCores.
    tn_pref = 1024
    if Np >= 2 * 128:
        tn_pref = min(tn_pref, max(128, (Np // 2) // 128 * 128))
    tn = _pick_tile(Np, tn_pref, 128)

    bpe = jnp.dtype(compute_dtype).itemsize
    single_k = Kp <= 2048            # whole reduction fits in one VMEM tile

    if single_k:
        tk = Kp
        grid = (Mp // tm, Np // tn)
        kernel = _affine_kernel_2d
        in_specs = [
            pl.BlockSpec((tm, tk), lambda i, j: (i, 0)),   # x tile
            pl.BlockSpec((tk, tn), lambda i, j: (0, j)),   # W_comb tile
            pl.BlockSpec((1, tn), lambda i, j: (0, j)),    # bias tile
        ]
        out_spec = pl.BlockSpec((tm, tn), lambda i, j: (i, j))
        dim_sem = ("parallel", "parallel")
    else:
        tk = _pick_tile(Kp, 1024, 128)
        grid = (Mp // tm, Np // tn, Kp // tk)
        kernel = _affine_kernel_3d
        in_specs = [
            pl.BlockSpec((tm, tk), lambda i, j, k: (i, k)),
            pl.BlockSpec((tk, tn), lambda i, j, k: (k, j)),
            pl.BlockSpec((1, tn), lambda i, j, k: (0, j)),
        ]
        out_spec = pl.BlockSpec((tm, tn), lambda i, j, k: (i, j))
        dim_sem = ("parallel", "parallel", "arbitrary")

    # Explicit VMEM budget from the double-buffered tile footprint; capped at
    # 64 MiB so the same setting is legal on v7x (and raises v5e's 16 MiB default).
    vmem_need = 2 * (tm * tk * bpe + tk * tn * bpe + tn * 4 + tm * tn * 4)
    vmem_limit = int(min(64 << 20, max(32 << 20, vmem_need + (2 << 20))))

    cost = pl.CostEstimate(
        flops=2 * Mp * Kp * Np,
        transcendentals=0,
        bytes_accessed=bpe * (Mp * Kp + Kp * Np) + 4 * (Np + Mp * Np),
    )

    out_flat = pl.pallas_call(
        kernel,
        out_shape=jax.ShapeDtypeStruct((Mp, Np), jnp.float32),
        grid_spec=pltpu.PrefetchScalarGridSpec(
            num_scalar_prefetch=0,
            grid=grid,
            in_specs=in_specs,
            out_specs=out_spec,
        ),
        compiler_params=pltpu.CompilerParams(
            dimension_semantics=dim_sem,
            vmem_limit_bytes=vmem_limit),
        cost_estimate=cost,
    )(x_p, w_p, b_p)

    return out_flat[:M, :N].reshape(B, S, F_out)


# ---------------------------------------------------------------------------
# Parameters: PyTorch-Linear-style init of the raw module params, offline
# fusion (per-head linears -> concat-heads -> output linear) into a single
# affine map, offline zero-padding to (8,128)-aligned shapes, bf16 cast.
# ---------------------------------------------------------------------------
def init_params(key, cfg, *, compute_dtype=jnp.bfloat16):
    nhead = cfg["nhead"]
    d_model = cfg["d_model"]
    S = cfg["sequence_length"]
    in_dim = cfg["sequence_length_other"] * cfg["other_features"]
    F_out = cfg["output_features"]
    hidden = nhead * d_model

    # Fusion guard: fused W_comb is (in_dim, S*F_out); only smaller than the
    # unfused weights (~nhead*S*d_model*in_dim) when F_out <= nhead*d_model.
    # TODO(synk): implement an unfused two-matmul pipeline for F_out > nhead*d_model.
    assert F_out <= hidden, "fused path would increase HBM weight traffic"

    keys = jax.random.split(key, 2 * nhead + 2)
    head_ws, head_bs = [], []
    bound1 = 1.0 / (in_dim ** 0.5)
    for h in range(nhead):
        w = jax.random.uniform(keys[2 * h], (S * d_model, in_dim),
                               minval=-bound1, maxval=bound1, dtype=jnp.float32)
        b = jax.random.uniform(keys[2 * h + 1], (S * d_model,),
                               minval=-bound1, maxval=bound1, dtype=jnp.float32)
        head_ws.append(w)
        head_bs.append(b)

    bound2 = 1.0 / (hidden ** 0.5)
    wo = jax.random.uniform(keys[-2], (F_out, hidden),
                            minval=-bound2, maxval=bound2, dtype=jnp.float32)
    bo = jax.random.uniform(keys[-1], (F_out,),
                            minval=-bound2, maxval=bound2, dtype=jnp.float32)

    # ---- offline fusion (module is affine in `other`: activation=None) -----
    # out[b, s, f] = sum_k x[b,k] * W_comb[k, s*F_out+f] + b_comb[s*F_out+f]
    w_stack = jnp.stack(head_ws).reshape(nhead, S, d_model, in_dim)   # (h,s,d,k)
    wo_r = wo.reshape(F_out, nhead, d_model)                          # (f,h,d)
    w_comb = jnp.einsum("hsdk,fhd->ksf", w_stack, wo_r).reshape(in_dim, S * F_out)
    b_stack = jnp.stack(head_bs).reshape(nhead, S, d_model)           # (h,s,d)
    b_comb = (jnp.einsum("hsd,fhd->sf", b_stack, wo_r) + bo[None, :]
              ).reshape(1, S * F_out)

    # ---- offline zero-pad to lane/sublane-aligned shapes + bf16 cast --------
    Kp = _round_up(in_dim, 128)
    Np = _round_up(S * F_out, 128)
    w_pad = jnp.zeros((Kp, Np), compute_dtype).at[:in_dim, :S * F_out].set(
        w_comb.astype(compute_dtype))
    b_pad = jnp.zeros((1, Np), jnp.float32).at[:, :S * F_out].set(b_comb)

    return (w_pad, b_pad), (w_comb, b_comb), (head_ws, head_bs, wo, bo)


# ---------------------------------------------------------------------------
# Pure-JAX reference mirroring the PyTorch module exactly (unfused, f32).
# ---------------------------------------------------------------------------
def reference_forward(other, raw_params, cfg):
    head_ws, head_bs, wo, bo = raw_params
    B = other.shape[0]
    S, d_model = cfg["sequence_length"], cfg["d_model"]
    x = other.reshape(B, -1)
    heads = []
    for w, b in zip(head_ws, head_bs):
        y = x @ w.T + b                               # (B, S*d_model)
        heads.append(y.reshape(B, S, d_model))
    concat = jnp.concatenate(heads, axis=-1)          # (B, S, nhead*d_model)
    return concat @ wo.T + bo                         # (B, S, F_out)


if __name__ == "__main__":
    cfg = dict(
        input_features=4,
        other_features=4,
        sequence_length=8,
        sequence_length_other=8,
        d_model=16,
        nhead=2,
        output_features=8,
    )
    batch = 2

    key = jax.random.PRNGKey(0)
    k_in, k_other, k_params = jax.random.split(key, 3)

    input_ = jax.random.normal(
        k_in, (batch, cfg["sequence_length"], cfg["input_features"]),
        dtype=jnp.float32)
    other = jax.random.normal(
        k_other, (batch, cfg["sequence_length_other"], cfg["other_features"]),
        dtype=jnp.float32)

    params, fused_f32, raw_params = init_params(k_params, cfg)

    out = taylor_cross_attention_forward(input_, other, params, cfg)
    out = jax.block_until_ready(out)

    S, F_out = cfg["sequence_length"], cfg["output_features"]
    assert out.shape == (batch, S, F_out)
    # Mirrors the PyTorch module's runtime NaN assert (debug-only, host-side).
    assert not bool(jnp.isnan(out).any())

    # (1) Kernel-math check vs a bf16-quantization-matched fused reference
    #     (same weight/input rounding, f32 accumulation) — tight tolerance.
    w_comb, b_comb = fused_f32
    x_flat = other.reshape(batch, -1)
    ref_q = (jnp.dot(x_flat.astype(jnp.bfloat16), w_comb.astype(jnp.bfloat16),
                     preferred_element_type=jnp.float32) + b_comb
             ).reshape(batch, S, F_out)
    assert jnp.allclose(out, ref_q, atol=1e-4, rtol=1e-4)

    # (2) End-to-end check vs the unfused f32 PyTorch-style reference — loose
    #     tolerance accounts for the bf16 weight/activation cast.
    ref = reference_forward(other, raw_params, cfg)
    assert jnp.allclose(out, ref, atol=2e-2, rtol=2e-2)

    print("KERNEL_OK")
</pallas_src>

<mosaic_0001>
module attributes {stable_mosaic.version = 11 : i64} {
  func.func @_affine_kernel_2d(%arg0: i32, %arg1: i32, %arg2: memref<8x128xbf16, #tpu.memory_space<vmem>>, %arg3: memref<128x128xbf16, #tpu.memory_space<vmem>>, %arg4: memref<1x128xf32, #tpu.memory_space<vmem>>, %arg5: memref<8x128xf32, #tpu.memory_space<vmem>>) attributes {dimension_semantics = [#tpu.dimension_semantics<parallel>, #tpu.dimension_semantics<parallel>], iteration_bounds = array<i64: 1, 1>, scalar_prefetch = 0 : i64, scratch_operands = 0 : i64, tpu.core_type = #tpu.core_type<tc>, window_params = [{transform_indices = @transform_0, window_bounds = array<i64: 8, 128>}, {transform_indices = @transform_1, window_bounds = array<i64: 128, 128>}, {transform_indices = @transform_2, window_bounds = array<i64: 1, 128>}, {transform_indices = @transform_3, window_bounds = array<i64: 8, 128>}]} {
    %c0 = arith.constant 0 : index
    %c0_0 = arith.constant 0 : index
    %0 = vector.load %arg2[%c0, %c0_0] : memref<8x128xbf16, #tpu.memory_space<vmem>>, vector<8x128xbf16>
    %c0_1 = arith.constant 0 : index
    %c0_2 = arith.constant 0 : index
    %1 = vector.load %arg3[%c0_1, %c0_2] : memref<128x128xbf16, #tpu.memory_space<vmem>>, vector<128x128xbf16>
    %cst = arith.constant dense<0.000000e+00> : vector<8x128xf32>
    %2 = tpu.matmul %0, %1, %cst {dimension_numbers = #tpu.dot_dimension_numbers<[1], [0], [0], [1], [0, 0, 1, 1], [], []>} : vector<8x128xbf16>, vector<128x128xbf16>, vector<8x128xf32> -> vector<8x128xf32>
    %c0_3 = arith.constant 0 : index
    %c0_4 = arith.constant 0 : index
    %3 = vector.load %arg4[%c0_3, %c0_4] : memref<1x128xf32, #tpu.memory_space<vmem>>, vector<1x128xf32>
    %4 = vector.broadcast %3 : vector<1x128xf32> to vector<8x128xf32>
    %5 = arith.addf %2, %4 : vector<8x128xf32>
    %c0_5 = arith.constant 0 : index
    %c0_6 = arith.constant 0 : index
    %6 = vector.load %arg5[%c0_5, %c0_6] : memref<8x128xf32, #tpu.memory_space<vmem>>, vector<8x128xf32>
    tpu.vector_store %arg5[%c0_5, %c0_6], %5 {strides = array<i32>} : memref<8x128xf32, #tpu.memory_space<vmem>>, vector<8x128xf32>,
    return
  }
  func.func @transform_0(%arg0: i32, %arg1: i32) -> (i32, i32) {
    %c0_i32 = arith.constant 0 : i32
    %c0_i32_0 = arith.constant 0 : i32
    return %arg0, %c0_i32 : i32, i32
  }
  func.func @transform_1(%arg0: i32, %arg1: i32) -> (i32, i32) {
    %c0_i32 = arith.constant 0 : i32
    %c0_i32_0 = arith.constant 0 : i32
    return %c0_i32, %arg1 : i32, i32
  }
  func.func @transform_2(%arg0: i32, %arg1: i32) -> (i32, i32) {
    %c0_i32 = arith.constant 0 : i32
    %c0_i32_0 = arith.constant 0 : i32
    return %c0_i32, %arg1 : i32, i32
  }
  func.func @transform_3(%arg0: i32, %arg1: i32) -> (i32, i32) {
    %c0_i32 = arith.constant 0 : i32
    return %arg0, %arg1 : i32, i32
  }
}

</mosaic_0001>

<bundles_post_ra>
// kernel: tpu_custom_call.1
= control target key start
LH: loop header
LB: loop body
LE: loop exit
PB: predicated region body
PF: predicated region fallthrough
CT: control target
= control target key end

     0   :  { %8 = vsyncpa [#allocation3], 0  ;;  %s307_s0 = inlined_call_operand.hbm [shape: bf16[8,128], index: 0, kind: input, shape index: {}]   ;;  %s308_s1 = inlined_call_operand.hbm [shape: bf16[128,128], index: 1, kind: input, shape index: {}]   ;;  %s309_s2 = inlined_call_operand.vmem [shape: f32[1,128], index: 2, kind: input, shape index: {}]   ;;  %s310_s3 = inlined_call_operand.hbm [shape: f32[8,128], index: 3, kind: output, shape index: {}]  }
   0x1   :  { %9 = vsyncpa [#allocation6], 0 }
   0x2   :  { %10 = vsyncpa [#allocation4], 0  ;;  %s16_s14 = sshll.u32 %s307_s0, 4  ;;  %s270_s15 = smov [#allocation2]   ;;  %s17_s14 = int_to_ptr.hbm [resolvable:$true] %s16_s14 }
   0x3   :  { %s18_s16 = sshll.u32 %s270_s15, 4  ;;  %s26_s19 = sshll.u32 %s308_s1, 4  ;;  %s19_s16 = int_to_ptr.vmem [resolvable:$true] %s18_s16  ;;  %s27_s19 = int_to_ptr.hbm [resolvable:$true] %s26_s19 }
   0x4   :  { %21 = dma.hbm_to_vmem [thread:$0]  %s17_s14, 64, %s19_s16, [#allocation3]  }
   0x5   :  { %s271_s20 = smov [#allocation5]   ;;  %s272_s22 = smov 64  }
   0x6   :  { %s28_s21 = sshll.u32 %s271_s20, 4  ;;  %s273_s23 = smov 4   ;;  %s29_s21 = int_to_ptr.vmem [resolvable:$true] %s28_s21 }
   0x7   :  { %34 = dma.hbm_to_vmem [thread:$0]  %s27_s19, 1024, %s29_s21, [#allocation6], %s272_s22, %s272_s22, %s273_s23  }
   0x8   :  { %264 = dma.done.wait [#allocation3], 64  }
   0x9   :  { %265 = vsyncadd [#allocation3], 4294967232 }
   0xa   :  { %266 = dma.done.wait [#allocation6], 1024  }
   0xb   :  { %267 = vsyncadd [#allocation6], 4294966272  ;;  %v185_v0 = vld [vmem:[#allocation5 + $0x38] sm:$0xff]  ;;  %v184_v1 = vld [vmem:[#allocation5 + $0x30] sm:$0xff]  ;;  %s274_s24 = smov [#allocation7]   ;;  %s135_s28 = sshll.u32 %s310_s3, 4  ;;  %s136_s28 = int_to_ptr.hbm [resolvable:$true] %s135_s28 }
   0xc   :  { %114 = vmatpush.bf16.msra.mxu0 %v185_v0  ;;  %v183_v2 = vld [vmem:[#allocation5 + $0x28] sm:$0xff]  ;;  %v182_v3 = vld [vmem:[#allocation5 + $0x20] sm:$0xff]  ;;  %v181_v4 = vld [vmem:[#allocation5 + $0x18] sm:$0xff]  ;;  %s133_s25 = sshll.u32 %s274_s24, 4  ;;  %s134_s25 = int_to_ptr.vmem [resolvable:$true] %s133_s25 }
   0xd   :  { %v180_v5 = vld [vmem:[#allocation5 + $0x10] sm:$0xff]  ;;  %v179_v6 = vld [vmem:[#allocation5 + $0x8] sm:$0xff]  ;;  %v178_v7 = vld [vmem:[#allocation5] sm:$0xff] }
   0xe   :  { %v45_v8 = vld [vmem:[#allocation2] sm:$0xf] }
   0xf   :  { %v191_v9 = vld [vmem:[%s309_s2] ss:$0 sm:$0xff] }
  0x10   :  { %115 = vmatpush.bf16.msra.mxu0 %v184_v1 }
  0x14   :  { %116 = vmatpush.bf16.msra.mxu0 %v183_v2 }
  0x18   :  { %117 = vmatpush.bf16.msra.mxu0 %v182_v3 }
  0x1c   :  { %118 = vmatpush.bf16.msra.mxu0 %v181_v4 }
  0x20   :  { %119 = vmatpush.bf16.msra.mxu0 %v180_v5 }
  0x24   :  { %120 = vmatpush.bf16.msra.mxu0 %v179_v6 }
  0x28   :  { %121 = vmatpush.bf16.msra.mxu0 %v178_v7 }
  0x2b   :  { %122 = vmatmul.bf16.vlgmr.msra.gmra.mxu0 %v45_v8 }
  0xa8   :  { %v123_v10 = vpop.f32.mrf.mxu0 }
  0xa9   :  { %v124_v11 = vadd.f32 %v191_v9, %v123_v10 }
  0xab   :  { %127 = vst [vmem:[#allocation7] sm:$0xff] %v124_v11 }
  0xac   :  { %138 = dma.vmem_to_hbm [thread:$0]  %s134_s25, 128, %s136_s28, [#allocation4]  }
  0xb0   :  { %v125_v12 = vpop.f32.mrf.mxu0 }
  0xb1   :  { %268 = dma.done.wait [#allocation4], 128  }
  0xb2   :  { %269 = vsyncadd [#allocation4], 4294967168 }
  0xb3   :  { %143 = vsyncpa [#allocation3], 1 }
  0xb4   :  { %144 = vsyncpa [#allocation6], 1 }
  0xb5   :  { %145 = vsyncpa [#allocation4], 1 }

</bundles_post_ra>
